<compile_context>
chip_gen: v6e
topology: v6e:2x2x1
jax: 0.10.0
libtpu: 0.0.40
codegen_flags: <defaults>
</compile_context>

<pallas_src>
import numpy as np

import jax
import jax.numpy as jnp
from jax.experimental import pallas as pl
from jax.experimental.pallas import tpu as pltpu


# ----------------------------------------------------------------------------
# Kernel
# ----------------------------------------------------------------------------
def _preact_block_kernel(x_ref, s1_ref, b1_ref, ktop_ref, kbot_ref,
                         w1_ref, b2_ref, w2_ref, o_ref):
    """One block = TB images packed as (TB*H, W*C).

    x_ref   : (M, W*Cin)  f32 activations (M = TB*H rows)
    s1_ref  : (1, W*Cin)  folded BN1 scale (per-lane)
    b1_ref  : (1, W*Cin)  folded BN1 bias
    ktop_ref: (M, 1)      0.0 at each image's first row, else 1.0
    kbot_ref: (M, 1)      0.0 at each image's last  row, else 1.0
    w1_ref  : (3, W*Cin,  W*Cout) bf16 banded conv1 weights (BN2 scale folded in)
    b2_ref  : (1, W*Cout) folded BN2 bias
    w2_ref  : (3, W*Cout, W*Cout) bf16 banded conv2 weights
    o_ref   : (M, W*Cout) f32 output
    """
    x = x_ref[...]                                                 # (M, WCin) f32
    # Pre-activation BN1 + ReLU; this is also the identity shortcut.
    pre = jnp.maximum(x * s1_ref[...] + b1_ref[...], 0.0)

    m = x.shape[0]
    ktop = ktop_ref[...]                                           # (M, 1)
    kbot = kbot_ref[...]                                           # (M, 1)

    def conv3x3(act, w_ref):
        # Center tap (kh = 1): no vertical shift.
        acc = jnp.dot(act.astype(jnp.bfloat16), w_ref[1],
                      preferred_element_type=jnp.float32)
        # Top tap (kh = 0): needs act[r-1]; zero at each image's first row
        # (mask also kills the circular wrap at the block boundary).
        up = pltpu.roll(act, shift=1, axis=0) * ktop
        acc = acc + jnp.dot(up.astype(jnp.bfloat16), w_ref[0],
                            preferred_element_type=jnp.float32)
        # Bottom tap (kh = 2): needs act[r+1]; zero at each image's last row.
        down = pltpu.roll(act, shift=m - 1, axis=0) * kbot
        acc = acc + jnp.dot(down.astype(jnp.bfloat16), w_ref[2],
                            preferred_element_type=jnp.float32)
        return acc

    h1 = conv3x3(pre, w1_ref)                       # conv1 (BN2 scale pre-folded)
    h2 = jnp.maximum(h1 + b2_ref[...], 0.0)         # + BN2 bias, ReLU
    out = conv3x3(h2, w2_ref) + pre                 # conv2 + identity shortcut
    o_ref[...] = out.astype(o_ref.dtype)            # no final ReLU (pre-act block)


# ----------------------------------------------------------------------------
# Wrapper-side parameter preparation (one-time folds, no per-call cost)
# ----------------------------------------------------------------------------
def _fold_bn(gamma, beta, mean, var, eps=1e-5):
    scale = (gamma / jnp.sqrt(var + eps)).astype(jnp.float32)
    bias = (beta - mean * scale).astype(jnp.float32)
    return scale, bias


def _banded_weights(w_oihw, Wdim):
    """PyTorch OIHW 3x3 weight -> (3, W*Cin, W*Cout) block-banded matrices.

    big[kh][w_in*Cin + ci, w_out*Cout + co] = w[co, ci, kh, kw] with
    kw = w_in - w_out + 1 when 0 <= kw <= 2 (zero otherwise), so one matmul per
    kh applies all three kw taps and W zero-padding is implicit in the band.
    """
    Cout, Cin, _, _ = w_oihw.shape
    w_hwio = jnp.transpose(w_oihw, (2, 3, 1, 0)).astype(jnp.float32)  # (3,3,Cin,Cout)
    w_in_idx = jnp.arange(Wdim)[:, None]
    w_out_idx = jnp.arange(Wdim)[None, :]
    kw = w_in_idx - w_out_idx + 1                                     # (W, W)
    valid = ((kw >= 0) & (kw <= 2)).astype(jnp.float32)
    kw_c = jnp.clip(kw, 0, 2)
    blocks = w_hwio[:, kw_c]                      # (3, W_in, W_out, Cin, Cout)
    blocks = blocks * valid[None, :, :, None, None]
    big = jnp.transpose(blocks, (0, 1, 3, 2, 4)).reshape(3, Wdim * Cin, Wdim * Cout)
    return big                                     # f32


def pack_params(p, W, eps=1e-5):
    """Fold BN, build banded weights, pre-tile per-lane vectors, cast MXU weights."""
    Cout, Cin, _, _ = p["w1"].shape
    s1, b1 = _fold_bn(p["bn1_gamma"], p["bn1_beta"], p["bn1_mean"], p["bn1_var"], eps)
    s2, b2 = _fold_bn(p["bn2_gamma"], p["bn2_beta"], p["bn2_mean"], p["bn2_var"], eps)
    s1p = jnp.tile(s1, W).reshape(1, W * Cin)
    b1p = jnp.tile(b1, W).reshape(1, W * Cin)
    s2p = jnp.tile(s2, W)                              # (W*Cout,)
    b2p = jnp.tile(b2, W).reshape(1, W * Cout)
    # Fold BN2 scale into conv1's output columns (in f32), then cast to bf16.
    w1big = _banded_weights(p["w1"], W) * s2p[None, None, :]
    w2big = _banded_weights(p["w2"], W)
    return {
        "s1": s1p, "b1": b1p, "b2": b2p,
        "w1": w1big.astype(jnp.bfloat16),
        "w2": w2big.astype(jnp.bfloat16),
    }


def _pick_images_per_step(n_imgs, img_h, target_rows=512):
    """Images per grid step: target ~target_rows MXU M-rows per step while
    keeping >= 2 grid steps (v7x has 2 TensorCores) and tb | n_imgs."""
    tb = max(1, min(n_imgs, max(1, target_rows // img_h)))
    if n_imgs >= 2:
        tb = max(1, min(tb, n_imgs // 2))
    while n_imgs % tb:
        tb -= 1
    return tb


def _boundary_masks(tb, img_h):
    """(tb*img_h, 1) f32 masks: 0.0 at each image's first / last row, else 1.0."""
    rows = np.arange(tb * img_h) % img_h
    ktop = (rows != 0).astype(np.float32).reshape(-1, 1)
    kbot = (rows != img_h - 1).astype(np.float32).reshape(-1, 1)
    return jnp.asarray(ktop), jnp.asarray(kbot)


# ----------------------------------------------------------------------------
# Forward passes
# ----------------------------------------------------------------------------
def preact_block_forward_nhwc(x_nhwc, packed, *, images_per_step=None):
    """PreActBlock forward on NHWC input with pre-packed parameters."""
    N, H, W, Cin = x_nhwc.shape
    WC_in = W * Cin
    WC_out = packed["w1"].shape[2]
    Cout = WC_out // W

    x2d = x_nhwc.reshape(N * H, WC_in).astype(jnp.float32)

    tb = images_per_step if images_per_step is not None else _pick_images_per_step(N, H)
    assert N % tb == 0, (N, tb)
    block_rows = tb * H
    ktop, kbot = _boundary_masks(tb, H)

    out2d = pl.pallas_call(
        _preact_block_kernel,
        out_shape=jax.ShapeDtypeStruct((N * H, WC_out), jnp.float32),
        grid_spec=pltpu.PrefetchScalarGridSpec(
            num_scalar_prefetch=0,
            grid=(N // tb,),
            in_specs=[
                pl.BlockSpec((block_rows, WC_in), lambda n: (n, 0)),     # x
                pl.BlockSpec((1, WC_in), lambda n: (0, 0)),              # s1
                pl.BlockSpec((1, WC_in), lambda n: (0, 0)),              # b1
                pl.BlockSpec((block_rows, 1), lambda n: (0, 0)),         # ktop
                pl.BlockSpec((block_rows, 1), lambda n: (0, 0)),         # kbot
                pl.BlockSpec((3, WC_in, WC_out), lambda n: (0, 0, 0)),   # w1 (bf16)
                pl.BlockSpec((1, WC_out), lambda n: (0, 0)),             # b2
                pl.BlockSpec((3, WC_out, WC_out), lambda n: (0, 0, 0)),  # w2 (bf16)
            ],
            out_specs=pl.BlockSpec((block_rows, WC_out), lambda n: (n, 0)),
        ),
        compiler_params=pltpu.CompilerParams(
            dimension_semantics=("parallel",),
            vmem_limit_bytes=48 * 1024 * 1024),
    )(x2d, packed["s1"], packed["b1"], ktop, kbot,
      packed["w1"], packed["b2"], packed["w2"])

    return out2d.reshape(N, H, W, Cout)


def preact_block_forward_nchw(x_nchw, p, eps=1e-5, images_per_step=None):
    """PyTorch-layout (NCHW) compatibility wrapper.

    Prefer preact_block_forward_nhwc + pack_params in an NHWC-resident model to
    avoid the two extra HBM transpose passes done here.
    """
    N, C, H, W = x_nchw.shape
    Cout = p["w1"].shape[0]
    assert C == Cout, "identity-shortcut configuration only (in_planes == planes)"
    packed = pack_params(p, W, eps)
    x_nhwc = jnp.transpose(x_nchw, (0, 2, 3, 1))
    out_nhwc = preact_block_forward_nhwc(x_nhwc, packed,
                                         images_per_step=images_per_step)
    return jnp.transpose(out_nhwc, (0, 3, 1, 2))


# ----------------------------------------------------------------------------
# Pure-JAX reference (inference-mode BN, identity shortcut — matches the
# provided PyTorch module: shortcut is applied to relu(bn1(x))).
# ----------------------------------------------------------------------------
def _reference(x_nchw, p, eps=1e-5):
    def conv3x3(x, w):
        return jax.lax.conv_general_dilated(
            x, w, window_strides=(1, 1), padding=((1, 1), (1, 1)),
            dimension_numbers=("NCHW", "OIHW", "NCHW"))

    def bn(x, g, b, m, v):
        g, b, m, v = (a[None, :, None, None] for a in (g, b, m, v))
        return (x - m) / jnp.sqrt(v + eps) * g + b

    pre = jax.nn.relu(bn(x_nchw, p["bn1_gamma"], p["bn1_beta"],
                         p["bn1_mean"], p["bn1_var"]))
    shortcut = pre
    out = conv3x3(pre, p["w1"])
    out = jax.nn.relu(bn(out, p["bn2_gamma"], p["bn2_beta"],
                         p["bn2_mean"], p["bn2_var"]))
    out = conv3x3(out, p["w2"])
    return out + shortcut


if __name__ == "__main__":
    # in_planes = planes = 8, stride = 1, W*C = 128 (one full lane width).
    # N = 8 so the kernel runs with 4 images per block and a 2-step grid
    # (exercises the cross-image boundary masks and megacore-friendly grid).
    N, C, H, W = 8, 8, 16, 16
    planes = C

    key = jax.random.PRNGKey(0)
    kx, kw1, kw2, km1, km2 = jax.random.split(key, 5)

    x = jax.random.normal(kx, (N, C, H, W), jnp.float32)

    params = {
        "w1": 0.1 * jax.random.normal(kw1, (planes, C, 3, 3), jnp.float32),
        "bn1_gamma": jnp.full((C,), 1.1, jnp.float32),
        "bn1_beta": jnp.full((C,), 0.05, jnp.float32),
        "bn1_mean": 0.1 * jax.random.normal(km1, (C,), jnp.float32),
        "bn1_var": jnp.linspace(0.5, 1.5, C, dtype=jnp.float32),
        "w2": 0.1 * jax.random.normal(kw2, (planes, planes, 3, 3), jnp.float32),
        "bn2_gamma": jnp.full((planes,), 0.9, jnp.float32),
        "bn2_beta": jnp.full((planes,), -0.02, jnp.float32),
        "bn2_mean": 0.1 * jax.random.normal(km2, (planes,), jnp.float32),
        "bn2_var": jnp.linspace(0.8, 1.2, planes, dtype=jnp.float32),
    }

    out = jax.block_until_ready(preact_block_forward_nchw(x, params))
    ref = jax.block_until_ready(_reference(x, params))

    assert out.shape == (N, planes, H, W), out.shape
    err = float(jnp.max(jnp.abs(out - ref)))
    # bf16 MXU inputs (f32 accumulation) -> tolerance reflects bf16 rounding.
    assert jnp.allclose(out, ref, atol=5e-2, rtol=5e-2), f"max abs err = {err}"
    print("KERNEL_OK")
</pallas_src>

<mosaic_0001>
module attributes {stable_mosaic.version = 11 : i64} {
  func.func @_preact_block_kernel(%arg0: i32, %arg1: memref<64x128xf32, #tpu.memory_space<vmem>>, %arg2: memref<1x128xf32, #tpu.memory_space<vmem>>, %arg3: memref<1x128xf32, #tpu.memory_space<vmem>>, %arg4: memref<64x1xf32, #tpu.memory_space<vmem>>, %arg5: memref<64x1xf32, #tpu.memory_space<vmem>>, %arg6: memref<3x128x128xbf16, #tpu.memory_space<vmem>>, %arg7: memref<1x128xf32, #tpu.memory_space<vmem>>, %arg8: memref<3x128x128xbf16, #tpu.memory_space<vmem>>, %arg9: memref<64x128xf32, #tpu.memory_space<vmem>>) attributes {dimension_semantics = [#tpu.dimension_semantics<parallel>], iteration_bounds = array<i64: 2>, scalar_prefetch = 0 : i64, scratch_operands = 0 : i64, tpu.core_type = #tpu.core_type<tc>, window_params = [{transform_indices = @transform_0, window_bounds = array<i64: 64, 128>}, {pipeline_mode = #tpu.pipeline_mode<synchronous>, transform_indices = @transform_1, window_bounds = array<i64: 1, 128>}, {pipeline_mode = #tpu.pipeline_mode<synchronous>, transform_indices = @transform_2, window_bounds = array<i64: 1, 128>}, {pipeline_mode = #tpu.pipeline_mode<synchronous>, transform_indices = @transform_3, window_bounds = array<i64: 64, 1>}, {pipeline_mode = #tpu.pipeline_mode<synchronous>, transform_indices = @transform_4, window_bounds = array<i64: 64, 1>}, {pipeline_mode = #tpu.pipeline_mode<synchronous>, transform_indices = @transform_5, window_bounds = array<i64: 3, 128, 128>}, {pipeline_mode = #tpu.pipeline_mode<synchronous>, transform_indices = @transform_6, window_bounds = array<i64: 1, 128>}, {pipeline_mode = #tpu.pipeline_mode<synchronous>, transform_indices = @transform_7, window_bounds = array<i64: 3, 128, 128>}, {transform_indices = @transform_8, window_bounds = array<i64: 64, 128>}]} {
    %c0 = arith.constant 0 : index
    %c0_0 = arith.constant 0 : index
    %0 = vector.load %arg1[%c0, %c0_0] : memref<64x128xf32, #tpu.memory_space<vmem>>, vector<64x128xf32>
    %c0_1 = arith.constant 0 : index
    %c0_2 = arith.constant 0 : index
    %1 = vector.load %arg2[%c0_1, %c0_2] : memref<1x128xf32, #tpu.memory_space<vmem>>, vector<1x128xf32>
    %2 = vector.broadcast %1 : vector<1x128xf32> to vector<64x128xf32>
    %3 = arith.mulf %0, %2 : vector<64x128xf32>
    %c0_3 = arith.constant 0 : index
    %c0_4 = arith.constant 0 : index
    %4 = vector.load %arg3[%c0_3, %c0_4] : memref<1x128xf32, #tpu.memory_space<vmem>>, vector<1x128xf32>
    %5 = vector.broadcast %4 : vector<1x128xf32> to vector<64x128xf32>
    %6 = arith.addf %3, %5 : vector<64x128xf32>
    %cst = arith.constant 0.000000e+00 : f32
    %7 = vector.broadcast %cst : f32 to vector<64x128xf32>
    %8 = arith.maximumf %6, %7 : vector<64x128xf32>
    %c0_5 = arith.constant 0 : index
    %c0_6 = arith.constant 0 : index
    %9 = vector.load %arg4[%c0_5, %c0_6] : memref<64x1xf32, #tpu.memory_space<vmem>>, vector<64x1xf32>
    %c0_7 = arith.constant 0 : index
    %c0_8 = arith.constant 0 : index
    %10 = vector.load %arg5[%c0_7, %c0_8] : memref<64x1xf32, #tpu.memory_space<vmem>>, vector<64x1xf32>
    %11 = arith.truncf %8 : vector<64x128xf32> to vector<64x128xbf16>
    %c1 = arith.constant 1 : index
    %c0_9 = arith.constant 0 : index
    %c0_10 = arith.constant 0 : index
    %12 = vector.load %arg6[%c1, %c0_9, %c0_10] : memref<3x128x128xbf16, #tpu.memory_space<vmem>>, vector<1x128x128xbf16>
    %13 = vector.shape_cast %12 : vector<1x128x128xbf16> to vector<128x128xbf16>
    %cst_11 = arith.constant dense<0.000000e+00> : vector<64x128xf32>
    %14 = tpu.matmul %11, %13, %cst_11 {dimension_numbers = #tpu.dot_dimension_numbers<[1], [0], [0], [1], [0, 0, 1, 1], [], []>} : vector<64x128xbf16>, vector<128x128xbf16>, vector<64x128xf32> -> vector<64x128xf32>
    %c1_i32 = arith.constant 1 : i32
    %15 = tpu.dynamic_rotate %8 by %c1_i32 dim 0 : vector<64x128xf32>, i32 -> vector<64x128xf32>
    %16 = vector.broadcast %9 : vector<64x1xf32> to vector<64x128xf32>
    %17 = arith.mulf %15, %16 : vector<64x128xf32>
    %18 = arith.truncf %17 : vector<64x128xf32> to vector<64x128xbf16>
    %c0_12 = arith.constant 0 : index
    %c0_13 = arith.constant 0 : index
    %c0_14 = arith.constant 0 : index
    %19 = vector.load %arg6[%c0_12, %c0_13, %c0_14] : memref<3x128x128xbf16, #tpu.memory_space<vmem>>, vector<1x128x128xbf16>
    %20 = vector.shape_cast %19 : vector<1x128x128xbf16> to vector<128x128xbf16>
    %cst_15 = arith.constant dense<0.000000e+00> : vector<64x128xf32>
    %21 = tpu.matmul %18, %20, %cst_15 {dimension_numbers = #tpu.dot_dimension_numbers<[1], [0], [0], [1], [0, 0, 1, 1], [], []>} : vector<64x128xbf16>, vector<128x128xbf16>, vector<64x128xf32> -> vector<64x128xf32>
    %22 = arith.addf %14, %21 : vector<64x128xf32>
    %c63_i32 = arith.constant 63 : i32
    %23 = tpu.dynamic_rotate %8 by %c63_i32 dim 0 : vector<64x128xf32>, i32 -> vector<64x128xf32>
    %24 = vector.broadcast %10 : vector<64x1xf32> to vector<64x128xf32>
    %25 = arith.mulf %23, %24 : vector<64x128xf32>
    %26 = arith.truncf %25 : vector<64x128xf32> to vector<64x128xbf16>
    %c2 = arith.constant 2 : index
    %c0_16 = arith.constant 0 : index
    %c0_17 = arith.constant 0 : index
    %27 = vector.load %arg6[%c2, %c0_16, %c0_17] : memref<3x128x128xbf16, #tpu.memory_space<vmem>>, vector<1x128x128xbf16>
    %28 = vector.shape_cast %27 : vector<1x128x128xbf16> to vector<128x128xbf16>
    %cst_18 = arith.constant dense<0.000000e+00> : vector<64x128xf32>
    %29 = tpu.matmul %26, %28, %cst_18 {dimension_numbers = #tpu.dot_dimension_numbers<[1], [0], [0], [1], [0, 0, 1, 1], [], []>} : vector<64x128xbf16>, vector<128x128xbf16>, vector<64x128xf32> -> vector<64x128xf32>
    %30 = arith.addf %22, %29 : vector<64x128xf32>
    %c0_19 = arith.constant 0 : index
    %c0_20 = arith.constant 0 : index
    %31 = vector.load %arg7[%c0_19, %c0_20] : memref<1x128xf32, #tpu.memory_space<vmem>>, vector<1x128xf32>
    %32 = vector.broadcast %31 : vector<1x128xf32> to vector<64x128xf32>
    %33 = arith.addf %30, %32 : vector<64x128xf32>
    %cst_21 = arith.constant 0.000000e+00 : f32
    %34 = vector.broadcast %cst_21 : f32 to vector<64x128xf32>
    %35 = arith.maximumf %33, %34 : vector<64x128xf32>
    %36 = arith.truncf %35 : vector<64x128xf32> to vector<64x128xbf16>
    %c1_22 = arith.constant 1 : index
    %c0_23 = arith.constant 0 : index
    %c0_24 = arith.constant 0 : index
    %37 = vector.load %arg8[%c1_22, %c0_23, %c0_24] : memref<3x128x128xbf16, #tpu.memory_space<vmem>>, vector<1x128x128xbf16>
    %38 = vector.shape_cast %37 : vector<1x128x128xbf16> to vector<128x128xbf16>
    %cst_25 = arith.constant dense<0.000000e+00> : vector<64x128xf32>
    %39 = tpu.matmul %36, %38, %cst_25 {dimension_numbers = #tpu.dot_dimension_numbers<[1], [0], [0], [1], [0, 0, 1, 1], [], []>} : vector<64x128xbf16>, vector<128x128xbf16>, vector<64x128xf32> -> vector<64x128xf32>
    %c1_i32_26 = arith.constant 1 : i32
    %40 = tpu.dynamic_rotate %35 by %c1_i32_26 dim 0 : vector<64x128xf32>, i32 -> vector<64x128xf32>
    %41 = vector.broadcast %9 : vector<64x1xf32> to vector<64x128xf32>
    %42 = arith.mulf %40, %41 : vector<64x128xf32>
    %43 = arith.truncf %42 : vector<64x128xf32> to vector<64x128xbf16>
    %c0_27 = arith.constant 0 : index
    %c0_28 = arith.constant 0 : index
    %c0_29 = arith.constant 0 : index
    %44 = vector.load %arg8[%c0_27, %c0_28, %c0_29] : memref<3x128x128xbf16, #tpu.memory_space<vmem>>, vector<1x128x128xbf16>
    %45 = vector.shape_cast %44 : vector<1x128x128xbf16> to vector<128x128xbf16>
    %cst_30 = arith.constant dense<0.000000e+00> : vector<64x128xf32>
    %46 = tpu.matmul %43, %45, %cst_30 {dimension_numbers = #tpu.dot_dimension_numbers<[1], [0], [0], [1], [0, 0, 1, 1], [], []>} : vector<64x128xbf16>, vector<128x128xbf16>, vector<64x128xf32> -> vector<64x128xf32>
    %47 = arith.addf %39, %46 : vector<64x128xf32>
    %c63_i32_31 = arith.constant 63 : i32
    %48 = tpu.dynamic_rotate %35 by %c63_i32_31 dim 0 : vector<64x128xf32>, i32 -> vector<64x128xf32>
    %49 = vector.broadcast %10 : vector<64x1xf32> to vector<64x128xf32>
    %50 = arith.mulf %48, %49 : vector<64x128xf32>
    %51 = arith.truncf %50 : vector<64x128xf32> to vector<64x128xbf16>
    %c2_32 = arith.constant 2 : index
    %c0_33 = arith.constant 0 : index
    %c0_34 = arith.constant 0 : index
    %52 = vector.load %arg8[%c2_32, %c0_33, %c0_34] : memref<3x128x128xbf16, #tpu.memory_space<vmem>>, vector<1x128x128xbf16>
    %53 = vector.shape_cast %52 : vector<1x128x128xbf16> to vector<128x128xbf16>
    %cst_35 = arith.constant dense<0.000000e+00> : vector<64x128xf32>
    %54 = tpu.matmul %51, %53, %cst_35 {dimension_numbers = #tpu.dot_dimension_numbers<[1], [0], [0], [1], [0, 0, 1, 1], [], []>} : vector<64x128xbf16>, vector<128x128xbf16>, vector<64x128xf32> -> vector<64x128xf32>
    %55 = arith.addf %47, %54 : vector<64x128xf32>
    %56 = arith.addf %55, %8 : vector<64x128xf32>
    %c0_36 = arith.constant 0 : index
    %c0_37 = arith.constant 0 : index
    %57 = vector.load %arg9[%c0_36, %c0_37] : memref<64x128xf32, #tpu.memory_space<vmem>>, vector<64x128xf32>
    tpu.vector_store %arg9[%c0_36, %c0_37], %56 {strides = array<i32>} : memref<64x128xf32, #tpu.memory_space<vmem>>, vector<64x128xf32>,
    return
  }
  func.func @transform_0(%arg0: i32) -> (i32, i32) {
    %c0_i32 = arith.constant 0 : i32
    %c0_i32_0 = arith.constant 0 : i32
    return %arg0, %c0_i32 : i32, i32
  }
  func.func @transform_1(%arg0: i32) -> (i32, i32) {
    %c0_i32 = arith.constant 0 : i32
    %c0_i32_0 = arith.constant 0 : i32
    %c0_i32_1 = arith.constant 0 : i32
    return %c0_i32, %c0_i32_0 : i32, i32
  }
  func.func @transform_2(%arg0: i32) -> (i32, i32) {
    %c0_i32 = arith.constant 0 : i32
    %c0_i32_0 = arith.constant 0 : i32
    %c0_i32_1 = arith.constant 0 : i32
    return %c0_i32, %c0_i32_0 : i32, i32
  }
  func.func @transform_3(%arg0: i32) -> (i32, i32) {
    %c0_i32 = arith.constant 0 : i32
    %c0_i32_0 = arith.constant 0 : i32
    %c0_i32_1 = arith.constant 0 : i32
    return %c0_i32, %c0_i32_0 : i32, i32
  }
  func.func @transform_4(%arg0: i32) -> (i32, i32) {
    %c0_i32 = arith.constant 0 : i32
    %c0_i32_0 = arith.constant 0 : i32
    %c0_i32_1 = arith.constant 0 : i32
    return %c0_i32, %c0_i32_0 : i32, i32
  }
  func.func @transform_5(%arg0: i32) -> (i32, i32, i32) {
    %c0_i32 = arith.constant 0 : i32
    %c0_i32_0 = arith.constant 0 : i32
    %c0_i32_1 = arith.constant 0 : i32
    %c0_i32_2 = arith.constant 0 : i32
    return %c0_i32, %c0_i32_0, %c0_i32_1 : i32, i32, i32
  }
  func.func @transform_6(%arg0: i32) -> (i32, i32) {
    %c0_i32 = arith.constant 0 : i32
    %c0_i32_0 = arith.constant 0 : i32
    %c0_i32_1 = arith.constant 0 : i32
    return %c0_i32, %c0_i32_0 : i32, i32
  }
  func.func @transform_7(%arg0: i32) -> (i32, i32, i32) {
    %c0_i32 = arith.constant 0 : i32
    %c0_i32_0 = arith.constant 0 : i32
    %c0_i32_1 = arith.constant 0 : i32
    %c0_i32_2 = arith.constant 0 : i32
    return %c0_i32, %c0_i32_0, %c0_i32_1 : i32, i32, i32
  }
  func.func @transform_8(%arg0: i32) -> (i32, i32) {
    %c0_i32 = arith.constant 0 : i32
    %c0_i32_0 = arith.constant 0 : i32
    return %arg0, %c0_i32 : i32, i32
  }
}

</mosaic_0001>

<bundles_post_ra>
// kernel: tpu_custom_call.1
= control target key start
LH: loop header
LB: loop body
LE: loop exit
PB: predicated region body
PF: predicated region fallthrough
CT: control target
= control target key end

     0   :  { %13 = vsyncpa [#allocation3], 0  ;;  %s2552_s0 = inlined_call_operand.vmem [shape: f32[128,128], index: 0, kind: input, shape index: {}]   ;;  %s2553_s1 = inlined_call_operand.vmem [shape: f32[1,128], index: 1, kind: input, shape index: {}]   ;;  %s2554_s2 = inlined_call_operand.vmem [shape: f32[1,128], index: 2, kind: input, shape index: {}]   ;;  %s2555_s3 = inlined_call_operand.vmem [shape: f32[64,1], index: 3, kind: input, shape index: {}]   ;;  %s2556_s4 = inlined_call_operand.vmem [shape: f32[64,1], index: 4, kind: input, shape index: {}]   ;;  %s2557_s5 = inlined_call_operand.hbm [shape: bf16[3,128,128], index: 5, kind: input, shape index: {}]   ;;  %s2558_s6 = inlined_call_operand.vmem [shape: f32[1,128], index: 6, kind: input, shape index: {}]   ;;  %s2559_s7 = inlined_call_operand.hbm [shape: bf16[3,128,128], index: 7, kind: input, shape index: {}]   ;;  %s2560_s8 = inlined_call_operand.hbm [shape: f32[128,128], index: 8, kind: output, shape index: {}]  }
   0x1   :  { %14 = vsyncpa [#allocation6], 0 }
   0x2   :  { %15 = vsyncpa [#allocation4], 0 }
   0x3   :  { %17 = vsyncpa [#allocation4 + $0x1], 0  ;;  %s2109_s27 = smov 0   ;;  %s2111_s28 = smov 0  }
   0x4   :  { %s2113_s29 = smov 0   ;;  %s2115_s30 = smov 0  }
   0x5 LB: > { %s2130_s9 = sadd.s32 4294967295, %s2054_s30   ;;  %s1535_s10 = sadd.s32 4294967294, %s2054_s30   ;;  %s2054_s30 = sphi %s2115_s30, %s2574_s30   ;;  %s2050_s29 = sphi %s2113_s29, %s2573_s29   ;;  %s2046_s28 = sphi %s2111_s28, %s2572_s28   ;;  %s2042_s27 = sphi %s2109_s27, %s2571_s27  }
   0x6   : > { %s2134_s11 = sadd.s32 1, %s2054_s30   ;;  %s203_s12 = sadd.s32 1, %s2050_s29 }
   0x7   : > { %s200_s13 = ssub.s32 %s2054_s30, %s2134_s11  ;;  %p213_p0 = scmp.ne.s32.totalorder %s2050_s29, %s2046_s28 }
   0x8   : > { %p201_p1 = scmp.eq.s32.totalorder %s200_s13, 0  ;;  %p214_p2 = scmp.eq.s32.totalorder %s2130_s9, 1 }
   0x9   : > { %p219_p3 = scmp.ne.s32.totalorder %s2046_s28, %s2042_s27  ;;  %p220_p4 = scmp.eq.s32.totalorder %s1535_s10, 1 }
   0xa   : > { %s2145_s14 = scalar_select %p201_p1, %s2050_s29, %s203_s12  }
   0xb   : > { %p2147_p5 = por %p214_p2, %p213_p0  ;;  %p2151_p6 = por %p220_p4, %p219_p3 }
   0xc   : > { %p1536_p7 = scmp.ge.s32.totalorder %s2054_s30, 1  ;;  %p227_p8 = scmp.lt.s32.totalorder %s2054_s30, 3 }
   0xd   : > { %s2563_s16 = scalar_select %p2151_p6, 1, 0 }
   0xe   : > { %p2561_p9 = scmp.eq.s32.totalorder %s2130_s9, 0  ;;  %p2158_p10 = pnand %p1536_p7, %p227_p8 }
   0xf   : > { %s2056_s18 = smov [#allocation2]   ;;  %s2057_s21 = smov [#allocation5]  }
  0x10   : > { %s251_s19 = sshll.u32 %s2056_s18, 4  ;;  %p1829_p11 = pneg %p2158_p10  ;;  %s252_s19 = int_to_ptr.vmem [resolvable:$true] %s251_s19 }
  0x11   : > { %s267_s22 = sshll.u32 %s2057_s21, 4  ;;  %s1945_s23 = scalar_lea.vmem %s252_s19, 3072  ;;  %s268_s22 = int_to_ptr.vmem [resolvable:$true] %s267_s22 }
  0x12   : > { %p2166_p12 = pnand %p2561_p9, %p1829_p11  ;;  %p1946_p0 = scmp.ne.s32.totalorder %s252_s19, %s1945_s23 }
  0x13   : > { %p1953_p3 = scmp.lt.s32.totalorder %s252_s19, %s252_s19  ;;  %p1954_p4 = scmp.lt.s32.totalorder %s1945_s23, %s1945_s23 }
  0x14   : > { %p1936_p13 = pneg %p2166_p12 }
  0x15   : > { %p1955_p7 = por %p1954_p4, %p1953_p3 }
  0x16   : > { %p1948_p1 = pnand %p1946_p0, %p1936_p13 }
  0x18   : > { %p1949_p2 = pneg %p1948_p1 }
  0x1a   : > { %p1956_p8 = pnand %p1955_p7, %p1949_p2 }
  0x1c   : > { %1959 = shalt.err (!%p1956_p8)
}
  0x1d   : > { %s2058_s24 = smov 64   ;;  %s2059_s25 = smov 4  }
  0x1e   : > { %1832 = dma.hbm_to_vmem [thread:$0]  (!%p2166_p12), %s2557_s5, 3072, %s252_s19, [#allocation3], %s2058_s24, %s2058_s24, %s2059_s25  }
  0x1f   : > { %s1971_s12 = scalar_lea.vmem %s268_s22, 3072  ;;  %p1979_p9 = scmp.lt.s32.totalorder %s268_s22, %s268_s22 }
  0x20   : > { %p1972_p11 = scmp.ne.s32.totalorder %s268_s22, %s1971_s12  ;;  %p1980_p6 = scmp.lt.s32.totalorder %s1971_s12, %s1971_s12 }
  0x22   : > { %p1974_p0 = pnand %p1972_p11, %p1936_p13  ;;  %p1981_p3 = por %p1980_p6, %p1979_p9 }
  0x24   : > { %p1975_p1 = pneg %p1974_p0 }
  0x26   : > { %p1982_p2 = pnand %p1981_p3, %p1975_p1 }
  0x28   : > { %1985 = shalt.err (!%p1982_p2)
}
  0x29   : > { %1835 = dma.hbm_to_vmem [thread:$0]  (!%p2166_p12), %s2559_s7, 3072, %s268_s22, [#allocation6], %s2058_s24, %s2058_s24, %s2059_s25  }
  0x2a   : > { %292 = sbr.rel (%p2158_p10) target bundleno = 694 (0x2b6), region = 52  ;;  %p2566_p4 = scmp.eq.s32.totalorder (!%p2158_p10), %s2130_s9, 0 }
  0x2f   : > { %2029 = dma.done.wait (%p2566_p4), [#allocation3], 3072   ;;  %p2567_p13 = pmov %p2566_p4 }
  0x30   : > { %p2568_p7 = pmov %p2566_p4 }
  0x31   : > { %2031 = vsyncadd (%p2567_p13), [#allocation3], 4294964224 }
  0x32   : > { %2033 = dma.done.wait (%p2568_p7), [#allocation6], 3072   ;;  %p2569_p6 = pmov %p2566_p4 }
  0x33   : > { %v2060_v0 = vmov 0   ;;  %v386_v1 = vld [vmem:[%s2555_s3 + $0x10] sm:$0xff]  ;;  %v384_v2 = vld [vmem:[%s2555_s3] sm:$0xff]  ;;  %s1544_s22 = sshll.u32 %s2130_s9, 3  ;;  %v387_v3 = vld [vmem:[%s2555_s3 + $0x18] sm:$0xff]  ;;  %s1602_s10 = sshll.u32 %s2130_s9, 10 }
  0x34   : > { %2035 = vsyncadd (%p2569_p6), [#allocation6], 4294964224  ;;  %1885 = vset.pattern.permute.xlu1 %v2060_v0  ;;  %1884 = vset.pattern.permute.xlu0 %v2060_v0  ;;  %v385_v4 = vld [vmem:[%s2555_s3 + $0x8] sm:$0xff]  ;;  %p331_p9 = scmp.lt.s32.totalorder %s1544_s22, 15  ;;  %v388_v6 = vld [vmem:[%s2555_s3 + $0x20] sm:$0xff]  ;;  %s2061_s20 = smov [#allocation7]  }
  0x35   : > { %452 = vperm.xlu1 %1885, %v386_v1   ;;  %442 = vperm.xlu0 %1884, %v384_v2   ;;  %v389_v5 = vld [vmem:[%s2555_s3 + $0x28] sm:$0xff]  ;;  %v1886_v7 = vld [vmem:[#allocation2 + $0x38] sm:$0xff]   ;;  %v1888_v10 = vld [vmem:[#allocation2 + $0x30] sm:$0xff]   ;;  %s1990_s17 = sshll.u32 %s2061_s20, 4  ;;  %s1991_s17 = int_to_ptr.vmem [resolvable:$false] %s1990_s17 }
  0x36   : > { %v1887_v8 = vld [vmem:[#allocation2 + $0x78] sm:$0xff]   ;;  %s2576_s22 = smov (!%p331_p9, %s1544_s22), 15  ;;  %1675 = vmatprep.subr.bf16.mxu0 %v1886_v7  ;;  %v1889_v11 = vld [vmem:[#allocation2 + $0x70] sm:$0xff]   ;;  %v1890_v13 = vld [vmem:[#allocation2 + $0x28] sm:$0xff]  }
  0x37   : > { %v391_v9 = vld [vmem:[%s2555_s3 + $0x38] sm:$0xff]  ;;  %v390_v12 = vld [vmem:[%s2555_s3 + $0x30] sm:$0xff]  ;;  %1676 = vmatpush3.bf16.msra.mxu0 %v1886_v7  ;;  %1699 = vmatprep.subr.bf16.mxu1 %v1887_v8  ;;  %s1545_s23 = sshll.u32 %s2576_s22, 3  ;;  %v1891_v14 = vld [vmem:[#allocation2 + $0x68] sm:$0xff]   ;;  %s2507_s22 = scalar_lea.hbm %s2560_s8, %s1602_s10 }
  0x38   : > { %1700 = vmatpush3.bf16.msra.mxu1 %v1887_v8  ;;  %1677 = vmatprep.subr.bf16.mxu0 %v1888_v10  ;;  %v393_v15 = vld [vmem:[%s2556_s4 + $0x8] sm:$0xff]  ;;  %v392_v16 = vld [vmem:[%s2556_s4] sm:$0xff]  ;;  %s2232_s18 = scalar_lea.vmem %s2552_s0, %s1545_s23  ;;  %v395_v19 = vld [vmem:[%s2556_s4 + $0x18] sm:$0xff]  ;;  %v429_v8 = vlaneseq  ;;  %s327_s23 = sand.u32 1, %s2046_s28  }
  0x39   : > { %457 = vperm.xlu1 %1885, %v387_v3   ;;  %447 = vperm.xlu0 %1884, %v385_v4   ;;  %v1892_v17 = vld [vmem:[#allocation2 + $0x20] sm:$0xff]   ;;  %v394_v20 = vld [vmem:[%s2556_s4 + $0x10] sm:$0xff]  ;;  %v339_v21 = vld [vmem:[%s2232_s18 + $0x8] sm:$0xff]  ;;  %s1543_s24 = sshll.u32 %s327_s23, 6  ;;  %s2512_s9 = scalar_lea.sflag [#allocation4], %s327_s23 }
  0x3a   : > { %1701 = vmatprep.subr.bf16.mxu1 %v1889_v11  ;;  %v1893_v18 = vld [vmem:[#allocation2 + $0x60] sm:$0xff]   ;;  %v1894_v25 = vld [vmem:[#allocation2 + $0x18] sm:$0xff]   ;;  %v397_v28 = vld [vmem:[%s2556_s4 + $0x28] sm:$0xff]  ;;  %s2484_s25 = scalar_lea.vmem [#allocation7], %s1543_s24 }
  0x3b   : > { %1678 = vmatpush3.bf16.msra.mxu0 %v1888_v10  ;;  %v1546_v22 = vld [vmem:[%s2553_s1] ss:$0 sm:$0xff]  ;;  %v1895_v30 = vld [vmem:[#allocation2 + $0x58] sm:$0xff]   ;;  %v1896_v31 = vld [vmem:[#allocation2 + $0x10] sm:$0xff]   ;;  %s1451_s26 = sshll.u32 %s2484_s25, 4  ;;  %s2500_s26 = int_to_ptr.vmem [resolvable:$true] %s1451_s26 }
  0x3c   : > { %1702 = vmatpush3.bf16.msra.mxu1 %v1889_v11  ;;  %1679 = vmatprep.subr.bf16.mxu0 %v1890_v13  ;;  %v1547_v23 = vld [vmem:[%s2554_s2] ss:$0 sm:$0xff]  ;;  %v354_v26 = vmul.f32 %v1546_v22, %v339_v21  ;;  %v340_v32 = vld [vmem:[%s2232_s18 + $0x10] sm:$0xff]  ;;  %v345_v35 = vld [vmem:[%s2232_s18 + $0x38] sm:$0xff]  ;;  %s1986_s19 = scalar_lea.vmem %s2500_s26, 1024  ;;  %p1993_p11 = scmp.lt.s32.totalorder %s2500_s26, %s1991_s17 }
  0x3d   : > { %467 = vperm.xlu1 %1885, %v389_v5   ;;  %462 = vperm.xlu0 %1884, %v388_v6   ;;  %v338_v24 = vld [vmem:[%s2232_s18] sm:$0xff]  ;;  %v1897_v36 = vld [vmem:[#allocation2 + $0x50] sm:$0xff]   ;;  %v341_v37 = vld [vmem:[%s2232_s18 + $0x18] sm:$0xff]  ;;  %v355_v43 = vmul.f32 %v1546_v22, %v340_v32  ;;  %v360_v44 = vmul.f32 %v1546_v22, %v345_v35  ;;  %p1987_p10 = scmp.ne.s32.totalorder %s2500_s26, %s1986_s19 }
  0x3e   : > { %1703 = vmatprep.subr.bf16.mxu1 %v1891_v14  ;;  %v353_v27 = vmul.f32 %v1546_v22, %v338_v24  ;;  %v396_v29 = vld [vmem:[%s2556_s4 + $0x20] sm:$0xff]  ;;  %v369_v33 = vadd.f32 %v1547_v23, %v354_v26  ;;  %v343_v41 = vld [vmem:[%s2232_s18 + $0x28] sm:$0xff]  ;;  %v399_v42 = vld [vmem:[%s2556_s4 + $0x38] sm:$0xff]  ;;  %v356_v46 = vmul.f32 %v1546_v22, %v341_v37 }
  0x3f   : > { %1680 = vmatpush3.bf16.msra.mxu0 %v1890_v13  ;;  %v342_v40 = vld [vmem:[%s2232_s18 + $0x20] sm:$0xff]  ;;  %v398_v45 = vld [vmem:[%s2556_s4 + $0x30] sm:$0xff]  ;;  %v1898_v50 = vld [vmem:[#allocation2 + $0x8] sm:$0xff]   ;;  %v358_v51 = vmul.f32 %v1546_v22, %v343_v41  ;;  %v370_v53 = vadd.f32 %v1547_v23, %v355_v43  ;;  %v375_v54 = vadd.f32 %v1547_v23, %v360_v44  ;;  %p1988_p12 = pnand %p1987_p10, %p2147_p5 }
  0x40   : > { %1704 = vmatpush3.bf16.msra.mxu1 %v1891_v14  ;;  %1681 = vmatprep.subr.bf16.mxu0 %v1892_v17  ;;  %v368_v34 = vadd.f32 %v1547_v23, %v353_v27  ;;  %v2257_v38 = vmax.f32 %v369_v33, 0.0  ;;  %v357_v47 = vmul.f32 %v1546_v22, %v342_v40  ;;  %v344_v49 = vld [vmem:[%s2232_s18 + $0x30] sm:$0xff]  ;;  %v1899_v52 = vld [vmem:[#allocation2 + $0x48] sm:$0xff]   ;;  %v371_v56 = vadd.f32 %v1547_v23, %v356_v46  ;;  %v1900_v58 = vld [vmem:[#allocation2] sm:$0xff]   ;;  %s1992_s18 = scalar_lea.vmem %s1991_s17, 2048 }
  0x41   : > { %477 = vperm.xlu1 %1885, %v391_v9   ;;  %472 = vperm.xlu0 %1884, %v390_v12   ;;  %v359_v55 = vmul.f32 %v1546_v22, %v344_v49  ;;  %v373_v59 = vadd.f32 %v1547_v23, %v358_v51  ;;  %v1901_v61 = vld [vmem:[#allocation2 + $0x40] sm:$0xff]   ;;  %v2272_v62 = vmax.f32 %v370_v53, 0.0  ;;  %v2274_v63 = vmax.f32 %v375_v54, 0.0  ;;  %v1902_v0 = vld [vmem:[#allocation2 + $0xb8] sm:$0xff]   ;;  %v1904_v49 = vld [vmem:[#allocation2 + $0xa8] sm:$0xff]   ;;  %p1989_p8 = pneg %p1988_p12  ;;  %p1994_p0 = scmp.lt.s32.totalorder %s1992_s18, %s1986_s19 }
  0x42   : > { %1705 = vmatprep.subr.bf16.mxu1 %v1893_v18  ;;  %v2259_v39 = vmax.f32 %v368_v34, 0.0  ;;  %v372_v57 = vadd.f32 %v1547_v23, %v357_v47  ;;  %v2276_v1 = vmax.f32 %v371_v56, 0.0  ;;  %v2290_v9 = vshrl.u32 %v429_v8, 7 }
  0x43   : > { %1682 = vmatpush3.bf16.msra.mxu0 %v1892_v17  ;;  %v374_v60 = vadd.f32 %v1547_v23, %v359_v55  ;;  %v2280_v3 = vmax.f32 %v373_v59, 0.0  ;;  %v422_v10 = vrot.slane %v2257_v38, 7  ;;  %v423_v11 = vrot.slane %v2272_v62, 7  ;;  %p1995_p1 = por %p1994_p0, %p1993_p11 }
  0x44   : > { %1706 = vmatpush3.bf16.msra.mxu1 %v1893_v18  ;;  %1683 = vmatprep.subr.bf16.mxu0 %v1894_v25  ;;  %v400_v48 = vpack.c.bf16 %v2257_v38, %v2259_v39  ;;  %v2278_v2 = vmax.f32 %v372_v57, 0.0  ;;  %v401_v5 = vpack.c.bf16 %v2276_v1, %v2272_v62  ;;  %vm431_vm0 = vcmp.lt.s32.totalorder %v2290_v9, 1  ;;  %v1905_v57 = vld [vmem:[#allocation2 + $0xa0] sm:$0xff]  }
  0x45   : > { %758 = vperm.xlu1 %1885, %v393_v15   ;;  %753 = vperm.xlu0 %1884, %v392_v16   ;;  %v2282_v4 = vmax.f32 %v374_v60, 0.0  ;;  %v421_v12 = vrot.slane %v2259_v39, 7  ;;  %v428_v13 = vrot.slane %v2274_v63, 7  ;;  %v424_v14 = vrot.slane %v2276_v1, 7  ;;  %p1996_p3 = pnand %p1995_p1, %p1989_p8 }
  0x46   : > { %1707 = vmatprep.subr.bf16.mxu1 %v1895_v30  ;;  %1715 = vmatprep.mubr.bf16.mxu1 %v400_v48  ;;  %v402_v6 = vpack.c.bf16 %v2280_v3, %v2278_v2  ;;  %v437_v17 = vsel %vm431_vm0, %v422_v10, %v423_v11  ;;  %v425_v21 = vrot.slane %v2278_v2, 7  ;;  %v426_v22 = vrot.slane %v2280_v3, 7 }
  0x47   : > { %1684 = vmatpush3.bf16.msra.mxu0 %v1894_v25  ;;  %v403_v7 = vpack.c.bf16 %v2274_v63, %v2282_v4  ;;  %v438_v18 = vsel %vm431_vm0, %v421_v12, %v422_v10  ;;  %v735_v41 = vrot.slane %v2257_v38, 1  ;;  %v736_v44 = vrot.slane %v2272_v62, 1 }
  0x48   : > { %1708 = vmatpush3.bf16.msra.mxu1 %v1895_v30  ;;  %1685 = vmatprep.subr.bf16.mxu0 %v1896_v31  ;;  %v435_v30 = vsel %vm431_vm0, %v424_v14, %v425_v21  ;;  %vm742_vm1 = vcmp.lt.s32.totalorder %v2290_v9, 7  ;;  %v737_v8 = vrot.slane %v2276_v1, 1  ;;  %v738_v10 = vrot.slane %v2278_v2, 1 }
  0x49   : > { %768 = vperm.xlu1 %1885, %v395_v19   ;;  %763 = vperm.xlu0 %1884, %v394_v20   ;;  %v439_v19 = vsel %vm431_vm0, %v428_v13, %v421_v12  ;;  %v436_v20 = vsel %vm431_vm0, %v423_v11, %v424_v14  ;;  %v739_v11 = vrot.slane %v2280_v3, 1  ;;  %v740_v12 = vrot.slane %v2282_v4, 1 }
  0x4a   : > { %1709 = vmatprep.subr.bf16.mxu1 %v1897_v36  ;;  %v746_v14 = vsel %vm742_vm1, %v737_v8, %v738_v10 }
  0x4b   : > { %1686 = vmatpush3.bf16.msra.mxu0 %v1896_v31  ;;  %v427_v31 = vrot.slane %v2282_v4, 7 }
  0x4c   : > { %1710 = vmatpush3.bf16.msra.mxu1 %v1897_v36  ;;  %1687 = vmatprep.subr.bf16.mxu0 %v1898_v50  ;;  %v1903_v36 = vld [vmem:[#allocation2 + $0xb0] sm:$0xff]  }
  0x4d   : > { %778 = vperm.xlu1 %1885, %v397_v28   ;;  %773 = vperm.xlu0 %1884, %v396_v29   ;;  %v434_v29 = vsel %vm431_vm0, %v425_v21, %v426_v22  ;;  %v433_v43 = vsel %vm431_vm0, %v426_v22, %v427_v31  ;;  %v745_v21 = vsel %vm742_vm1, %v738_v10, %v739_v11 }
  0x4e   : > { %1711 = vmatprep.subr.bf16.mxu1 %v1899_v52 }
  0x4f   : > { %1688 = vmatpush3.bf16.msra.mxu0 %v1898_v50 }
  0x50   : > { %1712 = vmatpush3.bf16.msra.mxu1 %v1899_v52  ;;  %1689 = vmatprep.subr.bf16.mxu0 %v1900_v58  ;;  %v748_v52 = vsel %vm742_vm1, %v735_v41, %v736_v44 }
  0x51   : > { %788 = vperm.xlu1 %1885, %v399_v42   ;;  %783 = vperm.xlu0 %1884, %v398_v45   ;;  %v432_v42 = vsel %vm431_vm0, %v427_v31, %v428_v13  ;;  %v734_v45 = vrot.slane %v2259_v39, 1  ;;  %v1909_v13 = vld [vmem:[#allocation2 + $0x80] sm:$0xff]  }
  0x52   : > { %1713 = vmatprep.subr.bf16.mxu1 %v1901_v61 }
  0x53   : > { %1690 = vmatpush3.bf16.msra.mxu0 %v1900_v58  ;;  %v749_v53 = vsel %vm742_vm1, %v734_v45, %v735_v41 }
  0x54   : > { %1714 = vmatpush3.bf16.msra.mxu1 %v1901_v61  ;;  %1723 = vmatprep.subr.bf16.mxu0 %v1902_v0  ;;  %v1906_v61 = vld [vmem:[#allocation2 + $0x98] sm:$0xff]  }
  0x57   : > { %1716 = vmatmul.mubr.bf16.vlgmr.msra.gmra.mxu1 %v401_v5 }
  0x58   : > { %1719 = vmatprep.mubr.bf16.mxu1 %v402_v6 }
  0x5f   : > { %1720 = vmatmul.mubr.bf16.gmra.mxu1 %v403_v7  ;;  %v1908_v7 = vld [vmem:[#allocation2 + $0x88] sm:$0xff]  }
  0xb0   : > { %v2298_v15 = vpop.permute.xlu1 %452  ;;  %v2300_v16 = vpop.permute.xlu0 %442 }
  0xb1   : > { %v482_v25 = vmul.f32 %v2298_v15, %v437_v17  ;;  %v480_v26 = vmul.f32 %v2300_v16, %v439_v19  ;;  %v747_v17 = vsel %vm742_vm1, %v736_v44, %v737_v8  ;;  %v744_v19 = vsel %vm742_vm1, %v739_v11, %v740_v12  ;;  %v1913_v44 = vld [vmem:[#allocation5 + $0x38] sm:$0xff]  }
  0xb2   : > { %1747 = vmatprep.subr.bf16.mxu1 %v1913_v44 }
  0xb3   : > { %1748 = vmatpush3.bf16.msra.mxu1 %v1913_v44 }
  0xb4   : > { %v2312_v23 = vpop.permute.xlu1 %457  ;;  %v2314_v24 = vpop.permute.xlu0 %447 }
  0xb5   : > { %v483_v27 = vmul.f32 %v2312_v23, %v436_v20  ;;  %v481_v28 = vmul.f32 %v2314_v24, %v438_v18 }
  0xb7   : > { %v489_v32 = vpack.c.bf16 %v483_v27, %v482_v25  ;;  %v488_v33 = vpack.c.bf16 %v481_v28, %v480_v26  ;;  %v741_v28 = vrot.slane %v2274_v63, 1 }
  0xb8   : > { %v2325_v34 = vpop.permute.xlu1 %467  ;;  %v2327_v35 = vpop.permute.xlu0 %462 }
  0xb9   : > { %v485_v37 = vmul.f32 %v2325_v34, %v434_v29  ;;  %v484_v40 = vmul.f32 %v2327_v35, %v435_v30  ;;  %1691 = vmatprep.mubr.bf16.mxu0 %v488_v33 }
  0xba   : > { %1692 = vmatmul.mubr.bf16.vlgmr.msra.gmra.mxu0 %v489_v32  ;;  %v750_v32 = vsel %vm742_vm1, %v741_v28, %v734_v45  ;;  %v1912_v45 = vld [vmem:[#allocation5 + $0x68] sm:$0xff]  }
  0xbb   : > { %v490_v46 = vpack.c.bf16 %v485_v37, %v484_v40  ;;  %1724 = vmatpush3.bf16.msra.mxu0 %v1902_v0  ;;  %v1907_v0 = vld [vmem:[#allocation2 + $0x90] sm:$0xff]  }
  0xbc   : > { %v2339_v47 = vpop.permute.xlu1 %477  ;;  %v2341_v48 = vpop.permute.xlu0 %472  ;;  %1725 = vmatprep.subr.bf16.mxu0 %v1903_v36 }
  0xbd   : > { %v487_v50 = vmul.f32 %v2339_v47, %v432_v42  ;;  %v486_v51 = vmul.f32 %v2341_v48, %v433_v43  ;;  %1695 = vmatprep.mubr.bf16.mxu0 %v490_v46  ;;  %v1910_v42 = vld [vmem:[#allocation5 + $0x78] sm:$0xff]   ;;  %v1911_v43 = vld [vmem:[#allocation5 + $0x70] sm:$0xff]  }
  0xbe   : > { %v1915_v46 = vld [vmem:[#allocation5 + $0x30] sm:$0xff]  }
  0xbf   : > { %v491_v54 = vpack.c.bf16 %v487_v50, %v486_v51  ;;  %1726 = vmatpush3.bf16.msra.mxu0 %v1903_v36  ;;  %v743_v36 = vsel %vm742_vm1, %v740_v12, %v741_v28  ;;  %1749 = vmatprep.subr.bf16.mxu1 %v1915_v46  ;;  %v1916_v50 = vld [vmem:[#allocation5 + $0x58] sm:$0xff]   ;;  %v1917_v51 = vld [vmem:[#allocation5 + $0x28] sm:$0xff]  }
  0xc0   : > { %v2349_v55 = vpop.permute.xlu1 %758  ;;  %v2351_v56 = vpop.permute.xlu0 %753  ;;  %1727 = vmatprep.subr.bf16.mxu0 %v1904_v49  ;;  %1750 = vmatpush3.bf16.msra.mxu1 %v1915_v46 }
  0xc1   : > { %v792_v58 = vmul.f32 %v2349_v55, %v748_v52  ;;  %v791_v59 = vmul.f32 %v2351_v56, %v749_v53  ;;  %1751 = vmatprep.subr.bf16.mxu1 %v1917_v51  ;;  %v1918_v52 = vld [vmem:[#allocation5 + $0x50] sm:$0xff]   ;;  %v1919_v53 = vld [vmem:[#allocation5 + $0x20] sm:$0xff]  }
  0xc2   : > { %1696 = vmatmul.mubr.bf16.gmra.mxu0 %v491_v54  ;;  %v1920_v54 = vld [vmem:[#allocation5 + $0x48] sm:$0xff]  }
  0xc3   : > { %v799_v60 = vpack.c.bf16 %v792_v58, %v791_v59  ;;  %1728 = vmatpush3.bf16.msra.mxu0 %v1904_v49  ;;  %v1914_v49 = vld [vmem:[#allocation5 + $0x60] sm:$0xff]   ;;  %v1923_v59 = vld [vmem:[#allocation5 + $0x10] sm:$0xff]  }
  0xc4   : > { %1729 = vmatprep.subr.bf16.mxu0 %v1905_v57  ;;  %v2355_v5 = vpop.permute.xlu1 %768  ;;  %v2357_v6 = vpop.permute.xlu0 %763  ;;  %1752 = vmatpush3.bf16.msra.mxu1 %v1917_v51  ;;  %v1922_v58 = vld [vmem:[#allocation5 + $0x40] sm:$0xff]  }
  0xc5   : > { %1739 = vmatprep.mubr.bf16.mxu0 %v799_v60  ;;  %v794_v22 = vmul.f32 %v2355_v5, %v746_v14  ;;  %v793_v25 = vmul.f32 %v2357_v6, %v747_v17  ;;  %1753 = vmatprep.subr.bf16.mxu1 %v1919_v53  ;;  %v1924_v60 = vld [vmem:[#allocation5 + $0x8] sm:$0xff]  }
  0xc7   : > { %1730 = vmatpush3.bf16.msra.mxu0 %v1905_v57  ;;  %v800_v29 = vpack.c.bf16 %v794_v22, %v793_v25  ;;  %v1921_v57 = vld [vmem:[#allocation5 + $0x18] sm:$0xff]  }
  0xc8   : > { %1731 = vmatprep.subr.bf16.mxu0 %v1906_v61  ;;  %v2367_v18 = vpop.permute.xlu1 %778  ;;  %v2371_v20 = vpop.permute.xlu0 %773  ;;  %1754 = vmatpush3.bf16.msra.mxu1 %v1919_v53 }
  0xc9   : > { %v796_v26 = vmul.f32 %v2367_v18, %v744_v19  ;;  %v795_v27 = vmul.f32 %v2371_v20, %v745_v21  ;;  %1755 = vmatprep.subr.bf16.mxu1 %v1921_v57 }
  0xcb   : > { %1732 = vmatpush3.bf16.msra.mxu0 %v1906_v61  ;;  %v801_v30 = vpack.c.bf16 %v796_v26, %v795_v27  ;;  %v1925_v61 = vld [vmem:[#allocation5] sm:$0xff]  }
  0xcc   : > { %1733 = vmatprep.subr.bf16.mxu0 %v1907_v0  ;;  %v2380_v31 = vpop.permute.xlu1 %788  ;;  %v2384_v33 = vpop.permute.xlu0 %783  ;;  %1756 = vmatpush3.bf16.msra.mxu1 %v1921_v57 }
  0xcd   : > { %v798_v37 = vmul.f32 %v2380_v31, %v750_v32  ;;  %v797_v40 = vmul.f32 %v2384_v33, %v743_v36  ;;  %1757 = vmatprep.subr.bf16.mxu1 %v1923_v59 }
  0xcf   : > { %1734 = vmatpush3.bf16.msra.mxu0 %v1907_v0  ;;  %v802_v41 = vpack.c.bf16 %v798_v37, %v797_v40  ;;  %v2390_v0 = vld [vmem:[#allocation5 + $0xb8] sm:$0xff]  }
  0xd0   : > { %1735 = vmatprep.subr.bf16.mxu0 %v1908_v7  ;;  %1758 = vmatpush3.bf16.msra.mxu1 %v1923_v59 }
  0xd1   : > { %1759 = vmatprep.subr.bf16.mxu1 %v1924_v60 }
  0xd3   : > { %1736 = vmatpush3.bf16.msra.mxu0 %v1908_v7 }
  0xd4   : > { %1737 = vmatprep.subr.bf16.mxu0 %v1909_v13  ;;  %1760 = vmatpush3.bf16.msra.mxu1 %v1924_v60 }
  0xd5   : > { %1761 = vmatprep.subr.bf16.mxu1 %v1925_v61 }
  0xd7   : > { %1738 = vmatpush3.bf16.msra.mxu0 %v1909_v13 }
  0xd8   : > { %1771 = vmatprep.subr.bf16.mxu0 %v1910_v42  ;;  %1762 = vmatpush3.bf16.msra.mxu1 %v1925_v61 }
  0xd9   : > { %1795 = vmatprep.subr.bf16.mxu1 %v2390_v0 }
  0xda   : > { %1740 = vmatmul.mubr.bf16.vlgmr.msra.gmra.mxu0 %v800_v29 }
  0xdb   : > { %1743 = vmatprep.mubr.bf16.mxu0 %v801_v30  ;;  %1772 = vmatpush3.bf16.msra.mxu0 %v1910_v42 }
  0xdc   : > { %1773 = vmatprep.subr.bf16.mxu0 %v1911_v43 }
  0xdf   : > { %1774 = vmatpush3.bf16.msra.mxu0 %v1911_v43 }
  0xe0   : > { %1775 = vmatprep.subr.bf16.mxu0 %v1912_v45 }
  0xe2   : > { %1744 = vmatmul.mubr.bf16.gmra.mxu0 %v802_v41  ;;  %v1572_v41 = vld [vmem:[%s2558_s6] ss:$0 sm:$0xff] }
  0xe3   : > { %1776 = vmatpush3.bf16.msra.mxu0 %v1912_v45 }
  0xe4   : > { %1777 = vmatprep.subr.bf16.mxu0 %v1914_v49 }
  0xe7   : > { %1778 = vmatpush3.bf16.msra.mxu0 %v1914_v49 }
  0xe8   : > { %1779 = vmatprep.subr.bf16.mxu0 %v1916_v50 }
  0xeb   : > { %1780 = vmatpush3.bf16.msra.mxu0 %v1916_v50 }
  0xec   : > { %1781 = vmatprep.subr.bf16.mxu0 %v1918_v52 }
  0xef   : > { %1782 = vmatpush3.bf16.msra.mxu0 %v1918_v52 }
  0xf0   : > { %1783 = vmatprep.subr.bf16.mxu0 %v1920_v54 }
  0xf3   : > { %1784 = vmatpush3.bf16.msra.mxu0 %v1920_v54 }
  0xf4   : > { %1785 = vmatprep.subr.bf16.mxu0 %v1922_v58 }
  0xf7   : > { %1786 = vmatpush3.bf16.msra.mxu0 %v1922_v58 }
 0x117   : > { %v1717_v12 = vpop.f32.mrf.mxu1 }
 0x119   : > { %v703_v14 = vpop.f32.mrf.mxu1 }
 0x11b   : > { %v1718_v19 = vpop.f32.mrf.mxu1 }
 0x11d   : > { %v706_v22 = vpop.f32.mrf.mxu1 }
 0x11f   : > { %v1721_v26 = vpop.f32.mrf.mxu1 }
 0x121   : > { %v719_v32 = vpop.f32.mrf.mxu1 }
 0x123   : > { %v1722_v45 = vpop.f32.mrf.mxu1 }
 0x125   : > { %v722_v61 = vpop.f32.mrf.mxu1 }
 0x17a   : > { %v1693_v7 = vpop.f32.mrf.mxu0 }
 0x17b   : > { %v712_v28 = vadd.f32 %v1717_v12, %v1693_v7 }
 0x17c   : > { %v590_v8 = vpop.f32.mrf.mxu0 }
 0x17d   : > { %v704_v36 = vadd.f32 %v703_v14, %v590_v8 }
 0x17e   : > { %v1694_v10 = vpop.f32.mrf.mxu0 }
 0x17f   : > { %v715_v30 = vadd.f32 %v1718_v19, %v1694_v10 }
 0x180   : > { %v593_v11 = vpop.f32.mrf.mxu0 }
 0x181   : > { %v707_v43 = vadd.f32 %v706_v22, %v593_v11 }
 0x182   : > { %v1697_v13 = vpop.f32.mrf.mxu0 }
 0x183   : > { %v728_v53 = vadd.f32 %v1721_v26, %v1697_v13 }
 0x184   : > { %v606_v17 = vpop.f32.mrf.mxu0 }
 0x185   : > { %v720_v54 = vadd.f32 %v719_v32, %v606_v17 }
 0x186   : > { %v1698_v21 = vpop.f32.mrf.mxu0 }
 0x187   : > { %v731_v60 = vadd.f32 %v1722_v45, %v1698_v21 }
 0x188   : > { %v609_v25 = vpop.f32.mrf.mxu0 }
 0x189   : > { %v723_v22 = vadd.f32 %v722_v61, %v609_v25 }
 0x19a   : > { %v1741_v27 = vpop.f32.mrf.mxu0 }
 0x19b   : > { %v935_v37 = vadd.f32 %v1741_v27, %v712_v28 }
 0x19c   : > { %v902_v29 = vpop.f32.mrf.mxu0 }
 0x19d   : > { %v933_v44 = vadd.f32 %v902_v29, %v704_v36  ;;  %v950_v49 = vadd.f32 %v1572_v41, %v935_v37 }
 0x19e   : > { %v1742_v40 = vpop.f32.mrf.mxu0 }
 0x19f   : > { %v936_v42 = vadd.f32 %v1742_v40, %v715_v30  ;;  %v948_v57 = vadd.f32 %v1572_v41, %v933_v44  ;;  %v2396_v7 = vmax.f32 %v950_v49, 0.0 }
 0x1a0   : > { %v905_v46 = vpop.f32.mrf.mxu0 }
 0x1a1   : > { %v934_v50 = vadd.f32 %v905_v46, %v707_v43  ;;  %v951_v52 = vadd.f32 %v1572_v41, %v936_v42  ;;  %v2400_v27 = vmax.f32 %v948_v57, 0.0  ;;  %v987_v29 = vrot.slane %v2396_v7, 7 }
 0x1a2   : > { %v1745_v51 = vpop.f32.mrf.mxu0 }
 0x1a3   : > { %v949_v58 = vadd.f32 %v1572_v41, %v934_v50  ;;  %v939_v10 = vadd.f32 %v1745_v51, %v728_v53  ;;  %v2398_v14 = vmax.f32 %v951_v52, 0.0  ;;  %v985_v42 = vrot.slane %v2400_v27, 7 }
 0x1a4   : > { %v918_v59 = vpop.f32.mrf.mxu0 }
 0x1a5   : > { %v957_v8 = vmax.f32 %v949_v58, 0.0  ;;  %v937_v12 = vadd.f32 %v918_v59, %v720_v54  ;;  %v954_v21 = vadd.f32 %v1572_v41, %v939_v10  ;;  %v965_v36 = vpack.c.bf16 %v2398_v14, %v2396_v7 }
 0x1a6   : > { %v1746_v11 = vpop.f32.mrf.mxu0  ;;  %v988_v37 = vrot.slane %v2398_v14, 7 }
 0x1a7   : > { %v940_v19 = vadd.f32 %v1746_v11, %v731_v60  ;;  %v986_v13 = vrot.slane %v957_v8, 7  ;;  %v952_v17 = vadd.f32 %v1572_v41, %v937_v12  ;;  %v964_v32 = vpack.c.bf16 %v957_v8, %v2400_v27 }
 0x1a8   : > { %v921_v28 = vpop.f32.mrf.mxu0  ;;  %v2416_v49 = vmax.f32 %v954_v21, 0.0  ;;  %v997_v52 = vsel %vm431_vm0, %v987_v29, %v988_v37  ;;  %v1256_v10 = vrot.slane %v957_v8, 1  ;;  %v1927_v8 = vld [vmem:[#allocation5 + $0xb0] sm:$0xff]  }
 0x1a9   : > { %v955_v26 = vadd.f32 %v1572_v41, %v940_v19  ;;  %v938_v30 = vadd.f32 %v921_v28, %v723_v22  ;;  %v2407_v40 = vmax.f32 %v952_v17, 0.0  ;;  %1787 = vmatprep.mubr.bf16.mxu0 %v964_v32  ;;  %v998_v44 = vsel %vm431_vm0, %v986_v13, %v987_v29 }
 0x1aa   : > { %1788 = vmatmul.mubr.bf16.vlgmr.msra.gmra.mxu0 %v965_v36  ;;  %v999_v51 = vsel %vm431_vm0, %v985_v42, %v986_v13  ;;  %v1003_v53 = vmul.f32 %v998_v44, %v2298_v15  ;;  %v1004_v61 = vmul.f32 %v997_v52, %v2312_v23  ;;  %v991_v12 = vrot.slane %v2416_v49, 7  ;;  %v1929_v36 = vld [vmem:[#allocation5 + $0xa0] sm:$0xff]  }
 0x1ab   : > { %v2409_v25 = vmax.f32 %v955_v26, 0.0  ;;  %v953_v43 = vadd.f32 %v1572_v41, %v938_v30  ;;  %v989_v46 = vrot.slane %v2407_v40, 7  ;;  %v1002_v60 = vmul.f32 %v999_v51, %v2314_v24  ;;  %v1933_v44 = vld [vmem:[#allocation5 + $0x80] sm:$0xff]  }
 0x1ac   : > { %v1255_v24 = vrot.slane %v2400_v27, 1  ;;  %v1010_v23 = vpack.c.bf16 %v1004_v61, %v1003_v53 }
 0x1ad   : > { %v992_v45 = vrot.slane %v2409_v25, 7  ;;  %v2418_v50 = vmax.f32 %v953_v43, 0.0  ;;  %v996_v58 = vsel %vm431_vm0, %v988_v37, %v989_v46  ;;  %v967_v11 = vpack.c.bf16 %v2409_v25, %v2416_v49 }
 0x1ae   : > { %v1005_v22 = vmul.f32 %v996_v58, %v2327_v35  ;;  %v1269_v35 = vsel %vm742_vm1, %v1255_v24, %v1256_v10  ;;  %v1261_v43 = vrot.slane %v2416_v49, 1  ;;  %v1262_v49 = vrot.slane %v2409_v25, 1 }
 0x1af   : > { %v1000_v41 = vsel %vm431_vm0, %v992_v45, %v985_v42  ;;  %v990_v54 = vrot.slane %v2418_v50, 7  ;;  %v966_v57 = vpack.c.bf16 %v2418_v50, %v2407_v40  ;;  %v1271_v29 = vmul.f32 %v1269_v35, %v2351_v56  ;;  %v1931_v42 = vld [vmem:[#allocation5 + $0x90] sm:$0xff]  }
 0x1b0   : > { %v1001_v59 = vmul.f32 %v1000_v41, %v2300_v16  ;;  %v1257_v16 = vrot.slane %v2396_v7, 1  ;;  %v1928_v7 = vld [vmem:[#allocation5 + $0xa8] sm:$0xff]   ;;  %v1258_v56 = vrot.slane %v2398_v14, 1  ;;  %v1270_v58 = vsel %vm742_vm1, %v1262_v49, %v1255_v24 }
 0x1b1   : > { %1791 = vmatprep.mubr.bf16.mxu0 %v966_v57  ;;  %v995_v15 = vsel %vm431_vm0, %v989_v46, %v990_v54  ;;  %v994_v17 = vsel %vm431_vm0, %v990_v54, %v991_v12  ;;  %v1263_v57 = vsel %vm742_vm1, %v1261_v43, %v1262_v49 }
 0x1b2   : > { %v1009_v19 = vpack.c.bf16 %v1002_v60, %v1001_v59  ;;  %v1006_v28 = vmul.f32 %v995_v15, %v2325_v34  ;;  %1792 = vmatmul.mubr.bf16.gmra.mxu0 %v967_v11  ;;  %v1268_v26 = vsel %vm742_vm1, %v1256_v10, %v1257_v16  ;;  %v993_v34 = vsel %vm431_vm0, %v991_v12, %v992_v45 }
 0x1b3   : > { %v1007_v27 = vmul.f32 %v994_v17, %v2341_v48  ;;  %v1272_v21 = vmul.f32 %v1268_v26, %v2349_v55  ;;  %v1008_v30 = vmul.f32 %v993_v34, %v2339_v47  ;;  %v1932_v48 = vld [vmem:[#allocation5 + $0x88] sm:$0xff]   ;;  %v1259_v55 = vrot.slane %v2407_v40, 1 }
 0x1b4   : > { %1763 = vmatprep.mubr.bf16.mxu1 %v1009_v19  ;;  %v1011_v13 = vpack.c.bf16 %v1006_v28, %v1005_v22  ;;  %v1260_v47 = vrot.slane %v2418_v50, 1  ;;  %v1267_v40 = vsel %vm742_vm1, %v1257_v16, %v1258_v56 }
 0x1b5   : > { %1764 = vmatmul.mubr.bf16.vlgmr.msra.gmra.mxu1 %v1010_v23  ;;  %v1012_v32 = vpack.c.bf16 %v1008_v30, %v1007_v27  ;;  %v1279_v37 = vpack.c.bf16 %v1272_v21, %v1271_v29  ;;  %v1266_v46 = vsel %vm742_vm1, %v1258_v56, %v1259_v55  ;;  %v1273_v41 = vmul.f32 %v1267_v40, %v2357_v6 }
 0x1b6   : > { %1796 = vmatpush3.bf16.msra.mxu1 %v2390_v0  ;;  %1767 = vmatprep.mubr.bf16.mxu1 %v1011_v13  ;;  %v1930_v0 = vld [vmem:[#allocation5 + $0x98] sm:$0xff]   ;;  %v1264_v45 = vsel %vm742_vm1, %v1260_v47, %v1261_v43  ;;  %v1265_v51 = vsel %vm742_vm1, %v1259_v55, %v1260_v47  ;;  %v1274_v14 = vmul.f32 %v1266_v46, %v2355_v5 }
 0x1b7   : > { %1797 = vmatprep.subr.bf16.mxu1 %v1927_v8  ;;  %v1275_v50 = vmul.f32 %v1265_v51, %v2371_v20  ;;  %v1276_v52 = vmul.f32 %v1264_v45, %v2367_v18  ;;  %v1277_v5 = vmul.f32 %v1263_v57, %v2384_v33  ;;  %v1278_v20 = vmul.f32 %v1270_v58, %v2380_v31 }
 0x1b8   : > { %v1280_v53 = vpack.c.bf16 %v1274_v14, %v1273_v41 }
 0x1b9   : > { %v1281_v54 = vpack.c.bf16 %v1276_v52, %v1275_v50  ;;  %v1282_v25 = vpack.c.bf16 %v1278_v20, %v1277_v5 }
 0x1ba   : > { %1798 = vmatpush3.bf16.msra.mxu1 %v1927_v8 }
 0x1bb   : > { %1799 = vmatprep.subr.bf16.mxu1 %v1928_v7 }
 0x1bd   : > { %1768 = vmatmul.mubr.bf16.gmra.mxu1 %v1012_v32 }
 0x1be   : > { %1800 = vmatpush3.bf16.msra.mxu1 %v1928_v7  ;;  %1811 = vmatprep.mubr.bf16.mxu1 %v1279_v37 }
 0x1bf   : > { %1801 = vmatprep.subr.bf16.mxu1 %v1929_v36 }
 0x1c2   : > { %1802 = vmatpush3.bf16.msra.mxu1 %v1929_v36 }
 0x1c3   : > { %1803 = vmatprep.subr.bf16.mxu1 %v1930_v0 }
 0x1c6   : > { %1804 = vmatpush3.bf16.msra.mxu1 %v1930_v0 }
 0x1c7   : > { %1805 = vmatprep.subr.bf16.mxu1 %v1931_v42 }
 0x1ca   : > { %1806 = vmatpush3.bf16.msra.mxu1 %v1931_v42 }
 0x1cb   : > { %1807 = vmatprep.subr.bf16.mxu1 %v1932_v48 }
 0x1ce   : > { %1808 = vmatpush3.bf16.msra.mxu1 %v1932_v48 }
 0x1cf   : > { %1809 = vmatprep.subr.bf16.mxu1 %v1933_v44 }
 0x1d2   : > { %1810 = vmatpush3.bf16.msra.mxu1 %v1933_v44 }
 0x1d5   : > { %1812 = vmatmul.mubr.bf16.vlgmr.msra.gmra.mxu1 %v1280_v53 }
 0x1d6   : > { %1815 = vmatprep.mubr.bf16.mxu1 %v1281_v54 }
 0x1dd   : > { %1816 = vmatmul.mubr.bf16.gmra.mxu1 %v1282_v25 }
 0x26a   : > { %v1789_v61 = vpop.f32.mrf.mxu0 }
 0x26c   : > { %v1224_v12 = vpop.f32.mrf.mxu0 }
 0x26e   : > { %v1790_v9 = vpop.f32.mrf.mxu0 }
 0x270   : > { %v1227_v19 = vpop.f32.mrf.mxu0 }
 0x272   : > { %v1793_v31 = vpop.f32.mrf.mxu0 }
 0x274   : > { %v1240_v26 = vpop.f32.mrf.mxu0 }
 0x275   : > { %v1765_v6 = vpop.f32.mrf.mxu1 }
 0x276   : > { %v1233_v28 = vadd.f32 %v1789_v61, %v1765_v6  ;;  %v1794_v32 = vpop.f32.mrf.mxu0 }
 0x277   : > { %v1111_v18 = vpop.f32.mrf.mxu1 }
 0x278   : > { %v1225_v16 = vadd.f32 %v1224_v12, %v1111_v18 }
 0x279   : > { %v1766_v59 = vpop.f32.mrf.mxu1 }
 0x27a   : > { %v1236_v8 = vadd.f32 %v1790_v9, %v1766_v59 }
 0x27b   : > { %v1114_v60 = vpop.f32.mrf.mxu1 }
 0x27c   : > { %v1228_v34 = vadd.f32 %v1227_v19, %v1114_v60 }
 0x27d   : > { %v1769_v10 = vpop.f32.mrf.mxu1 }
 0x27e   : > { %v1249_v21 = vadd.f32 %v1793_v31, %v1769_v10 }
 0x27f   : > { %v1127_v15 = vpop.f32.mrf.mxu1 }
 0x280   : > { %v1241_v37 = vadd.f32 %v1240_v26, %v1127_v15 }
 0x281   : > { %v1770_v11 = vpop.f32.mrf.mxu1 }
 0x283   : > { %v1130_v22 = vpop.f32.mrf.mxu1 }
 0x295   : > { %v1813_v33 = vpop.f32.mrf.mxu1 }
 0x296   : > { %v1415_v24 = vadd.f32 %v1813_v33, %v1233_v28 }
 0x297   : > { %v1382_v23 = vpop.f32.mrf.mxu1 }
 0x298   : > { %v1423_v13 = vadd.f32 %v1415_v24, %v2272_v62  ;;  %v1413_v17 = vadd.f32 %v1382_v23, %v1225_v16 }
 0x299   : > { %v1814_v35 = vpop.f32.mrf.mxu1 }
 0x29a   : > { %1431 = vst [vmem:[%s2484_s25 + $0x10] sm:$0xff] %v1423_v13  ;;  %v1421_v7 = vadd.f32 %v1413_v17, %v2259_v39  ;;  %v1416_v27 = vadd.f32 %v1814_v35, %v1236_v8  ;;  %v1252_v39 = vadd.f32 %v1794_v32, %v1770_v11 }
 0x29b   : > { %v1385_v29 = vpop.f32.mrf.mxu1 }
 0x29c   : > { %1429 = vst [vmem:[%s2484_s25] sm:$0xff] %v1421_v7  ;;  %v1424_v30 = vadd.f32 %v1416_v27, %v2276_v1  ;;  %v1414_v62 = vadd.f32 %v1385_v29, %v1228_v34  ;;  %v1243_v1 = vpop.f32.mrf.mxu0 }
 0x29d   : > { %v1817_v36 = vpop.f32.mrf.mxu1  ;;  %v1244_v43 = vadd.f32 %v1243_v1, %v1130_v22 }
 0x29e   : > { %1432 = vst [vmem:[%s2484_s25 + $0x18] sm:$0xff] %v1424_v30  ;;  %v1422_v0 = vadd.f32 %v1414_v62, %v2257_v38  ;;  %v1419_v42 = vadd.f32 %v1817_v36, %v1249_v21 }
 0x29f   : > { %v1398_v48 = vpop.f32.mrf.mxu1 }
 0x2a0   : > { %1430 = vst [vmem:[%s2484_s25 + $0x8] sm:$0xff] %v1422_v0  ;;  %v1427_v55 = vadd.f32 %v1419_v42, %v2282_v4  ;;  %v1417_v47 = vadd.f32 %v1398_v48, %v1241_v37 }
 0x2a1   : > { %v1818_v56 = vpop.f32.mrf.mxu1 }
 0x2a2   : > { %1435 = vst [vmem:[%s2484_s25 + $0x30] sm:$0xff] %v1427_v55  ;;  %v1425_v44 = vadd.f32 %v1417_v47, %v2278_v2  ;;  %v1420_v38 = vadd.f32 %v1818_v56, %v1252_v39 }
 0x2a3   : > { %v1401_v46 = vpop.f32.mrf.mxu1 }
 0x2a4   : > { %1433 = vst [vmem:[%s2484_s25 + $0x20] sm:$0xff] %v1425_v44  ;;  %v1428_v45 = vadd.f32 %v1420_v38, %v2274_v63  ;;  %v1418_v51 = vadd.f32 %v1401_v46, %v1244_v43 }
 0x2a6   : > { %1436 = vst [vmem:[%s2484_s25 + $0x38] sm:$0xff] %v1428_v45  ;;  %v1426_v4 = vadd.f32 %v1418_v51, %v2280_v3 }
 0x2a8   : > { %1434 = vst [vmem:[%s2484_s25 + $0x28] sm:$0xff] %v1426_v4 }
 0x2a9   : > { %1999 = shalt.err (!%p1996_p3)
}
 0x2aa   : > { %s2000_s21 = scalar_lea.hbm %s2507_s22, 1024  ;;  %s2004_s25 = scalar_lea.hbm %s2560_s8, 2048 }
 0x2ab   : > { %p2001_p2 = scmp.ne.s32.totalorder %s2507_s22, %s2000_s21  ;;  %p2005_p7 = scmp.lt.s32.totalorder %s2507_s22, %s2560_s8 }
 0x2ac   : > { %p2006_p6 = scmp.lt.s32.totalorder %s2004_s25, %s2000_s21 }
 0x2ad   : > { %p2002_p4 = pnand %p2001_p2, %p2147_p5 }
 0x2ae   : > { %p2007_p9 = por %p2006_p6, %p2005_p7 }
 0x2af   : > { %p2003_p13 = pneg %p2002_p4 }
 0x2b1   : > { %p2008_p10 = pnand %p2007_p9, %p2003_p13 }
 0x2b3   : > { %2011 = shalt.err (!%p2008_p10)
}
 0x2b4   : > { %s2062_s13 = smov 128   ;;  %s2063_s19 = smov 8  }
 0x2b5   : > { %1827 = dma.vmem_to_hbm [thread:$0]  (%p2147_p5), %s2500_s26, 1024, %s2507_s22, %s2512_s9, %s2062_s13, %s2062_s13, %s2063_s19  }
 0x2b6 PF: > { %p1844_p12 = scmp.ge.s32.totalorder %s2054_s30, 2  ;;  %s1466_s20 = sand.u32 1, %s2042_s27  }
 0x2b7   : > { %p2570_p8 = scmp.ne.s32.totalorder %s2563_s16, 0  ;;  %s1467_s17 = scalar_lea.sflag [#allocation4], %s1466_s20 }
 0x2b9   : > { %p1837_p11 = pnand %p1844_p12, %p2570_p8 }
 0x2bb   : > { %p1838_p0 = pneg %p1837_p11 }
 0x2bd   : > { %2037 = dma.done.wait (%p1838_p0), %s1467_s17, 1024  }
 0x2be   : > { %2039 = vsyncadd (%p1838_p0), %s1467_s17, 4294966272  ;;  %p20_p1 = scmp.ge.s32.totalorder %s2134_s11, 4   ;;  %s2571_s27 = smov %s2046_s28 }
 0x2bf   : > { %s2572_s28 = smov %s2050_s29  ;;  %s2573_s29 = smov %s2145_s14 }
 0x2c0   : > { %s2574_s30 = smov %s2134_s11  ;;  %22 = sbr.rel (!%p20_p1) target bundleno = 5 (0x5), region = 100 }
 0x2c5   :  { %1472 = vsyncpa [#allocation3], 1 }
 0x2c6   :  { %1474 = vsyncpa [#allocation3 + $0x1], 1 }
 0x2c7   :  { %1475 = vsyncpa [#allocation6], 1 }
 0x2c8   :  { %1476 = vsyncpa [#allocation4], 1 }
 0x2c9   :  { %1478 = vsyncpa [#allocation4 + $0x1], 1 }

</bundles_post_ra>
